<compile_context>
chip_gen: v7x
topology: tpu7x:2x2x1
jax: 0.10.0
libtpu: 0.0.40
codegen_flags: <defaults>
</compile_context>

<pallas_src>
import jax
import jax.numpy as jnp
from jax.experimental import pallas as pl
from jax.experimental.pallas import tpu as pltpu


def _round_up(x, m):
    return ((x + m - 1) // m) * m


def _pick_tile(padded, cap, align):
    """Largest divisor of `padded` that is a multiple of `align` and <= cap."""
    cap = max(align, min(cap, padded))
    best = align
    d = align
    while d <= cap:
        if padded % d == 0:
            best = d
        d += align
    return best


def _hw_config():
    """Generation-aware (tm_cap, tn_cap, tk_cap, vmem_limit_bytes)."""
    vmem_cap = 64 * 1024 * 1024
    try:
        info = pltpu.get_tpu_info()
        vmem_cap = int(getattr(info, "vmem_capacity_bytes", vmem_cap))
    except Exception:
        pass
    if vmem_cap >= 96 * 1024 * 1024:
        # v5e / v6e: 128 MiB physical VMEM -> big tiles, raise the scoped limit.
        return 512, 1024, 1024, 64 * 1024 * 1024
    # v7x: 64 MiB physical VMEM -> capped tiles, leave runtime headroom.
    return 256, 1024, 1024, 40 * 1024 * 1024


def _linear_block_kernel(x_ref, w_ref, b_ref, o_ref):
    # x_ref : (tm, tk)  VMEM  activations tile
    # w_ref : (tk, tn)  VMEM  pre-transposed weight tile ((in, out) layout)
    # b_ref : (1,  tn)  VMEM  bias row tile
    # o_ref : (tm, tn)  VMEM  f32 output tile, resident across the K axis
    k = pl.program_id(2)
    partial = jnp.dot(x_ref[...], w_ref[...],
                      preferred_element_type=jnp.float32)

    @pl.when(k == 0)
    def _():
        o_ref[...] = b_ref[...] + partial

    @pl.when(k != 0)
    def _():
        o_ref[...] += partial


def prepare_linear_block_params(w, b):
    """One-time transform of the static parameters.

    In real use call this once at parameter-init / remap() time (W is static),
    NOT per forward call.

    w: (out_size, in_size) f32  (PyTorch Linear layout)
    b: (out_size, 1) f32        (module stores bias as a column vector)
    Returns (w_t_padded: (k_pad, n_pad), bias_row: (1, n_pad), out_size).
    """
    out_size, in_size = w.shape
    k_pad = _round_up(in_size, 128)
    n_pad = _round_up(out_size, 128)

    w_t = jnp.transpose(w).astype(jnp.float32)          # (in, out)
    if (k_pad, n_pad) != (in_size, out_size):
        w_t = jnp.pad(w_t, ((0, k_pad - in_size), (0, n_pad - out_size)))

    b_row = jnp.reshape(b, (1, out_size)).astype(jnp.float32)
    if n_pad != out_size:
        b_row = jnp.pad(b_row, ((0, 0), (0, n_pad - out_size)))

    return w_t, b_row, out_size


def linear_block_apply(x, w_t, b_row, out_size, *, tm=None, tn=None, tk=None):
    """Hot path: y = x @ W^T + b with pre-prepared (transposed/padded) params."""
    batch, in_size = x.shape
    k_pad, n_pad = w_t.shape
    m_pad = _round_up(batch, 8)

    tm_cap, tn_cap, tk_cap, vmem_limit = _hw_config()
    tm = _pick_tile(m_pad, tm or tm_cap, 8)
    tn = _pick_tile(n_pad, tn or tn_cap, 128)
    tk = _pick_tile(k_pad, tk or tk_cap, 128)

    # Guarantee >= 2 blocks along a "parallel" axis (keeps both v7x TCs busy).
    if m_pad // tm == 1 and n_pad // tn == 1:
        if tn % 256 == 0:
            tn //= 2
        elif tm % 16 == 0:
            tm //= 2

    x_p = x.astype(jnp.float32)
    if (m_pad, k_pad) != (batch, in_size):
        x_p = jnp.pad(x_p, ((0, m_pad - batch), (0, k_pad - in_size)))

    grid = (m_pad // tm, n_pad // tn, k_pad // tk)

    cost = pl.CostEstimate(
        flops=2 * batch * in_size * out_size,
        transcendentals=0,
        bytes_accessed=4 * (batch * in_size + in_size * out_size
                            + batch * out_size),
    )

    y_p = pl.pallas_call(
        _linear_block_kernel,
        out_shape=jax.ShapeDtypeStruct((m_pad, n_pad), jnp.float32),
        grid_spec=pltpu.PrefetchScalarGridSpec(
            num_scalar_prefetch=0,
            grid=grid,
            in_specs=[
                pl.BlockSpec((tm, tk), lambda i, j, k: (i, k)),   # x
                pl.BlockSpec((tk, tn), lambda i, j, k: (k, j)),   # W^T (in,out)
                pl.BlockSpec((1, tn), lambda i, j, k: (0, j)),    # bias row
            ],
            out_specs=pl.BlockSpec((tm, tn), lambda i, j, k: (i, j)),
        ),
        compiler_params=pltpu.CompilerParams(
            dimension_semantics=("parallel", "parallel", "arbitrary"),
            vmem_limit_bytes=vmem_limit,
        ),
        cost_estimate=cost,
    )(x_p, w_t, b_row)

    if (m_pad, n_pad) != (batch, out_size):
        y_p = y_p[:batch, :out_size]
    return y_p


def linear_block_forward(x, w, b, *, tm=None, tn=None, tk=None):
    """Convenience wrapper matching Linear_block.forward: y = x @ w.T + b."""
    w_t, b_row, out_size = prepare_linear_block_params(w, b)
    return linear_block_apply(x, w_t, b_row, out_size, tm=tm, tn=tn, tk=tk)


if __name__ == "__main__":
    key = jax.random.PRNGKey(0)
    kx, kw, kb, kx2, kw2, kb2, kx3, kw3, kb3 = jax.random.split(key, 9)

    # --- Test 1: module-sized small shapes (single grid point after padding) ---
    batch, in_size, out_size = 8, 32, 16
    stdv = 1.0 / in_size / 2.0  # mirrors __init__: stdv = 1.0 / in_size ** 1 / 2
    w = jax.random.uniform(kw, (out_size, in_size), jnp.float32,
                           minval=-stdv, maxval=stdv)
    b = jax.random.uniform(kb, (out_size, 1), jnp.float32,
                           minval=-stdv, maxval=stdv)
    x = jax.random.normal(kx, (batch, in_size), jnp.float32)

    y = jax.block_until_ready(linear_block_forward(x, w, b))
    y_ref = x @ w.T + b.reshape(1, out_size)
    assert y.shape == (batch, out_size)
    assert jnp.allclose(y, y_ref, atol=1e-5, rtol=1e-5)

    # --- Test 2: forced tiny tiles -> multi-step M/N/K grid + K accumulation ---
    b2_, in2, out2 = 16, 256, 384
    stdv2 = 1.0 / in2 / 2.0
    w2 = jax.random.uniform(kw2, (out2, in2), jnp.float32,
                            minval=-stdv2, maxval=stdv2)
    bb2 = jax.random.uniform(kb2, (out2, 1), jnp.float32,
                             minval=-stdv2, maxval=stdv2)
    x2 = jax.random.normal(kx2, (b2_, in2), jnp.float32)

    y2 = jax.block_until_ready(
        linear_block_forward(x2, w2, bb2, tm=8, tn=128, tk=128))
    y2_ref = x2 @ w2.T + bb2.reshape(1, out2)
    assert y2.shape == (b2_, out2)
    assert jnp.allclose(y2, y2_ref, atol=1e-4, rtol=1e-4)

    # --- Test 3: default tiles; exercises the >=2-parallel-block (TC) split ---
    b3_, in3, out3 = 64, 512, 512
    stdv3 = 1.0 / in3 / 2.0
    w3 = jax.random.uniform(kw3, (out3, in3), jnp.float32,
                            minval=-stdv3, maxval=stdv3)
    bb3 = jax.random.uniform(kb3, (out3, 1), jnp.float32,
                             minval=-stdv3, maxval=stdv3)
    x3 = jax.random.normal(kx3, (b3_, in3), jnp.float32)

    w3_t, b3_row, out3_sz = prepare_linear_block_params(w3, bb3)  # one-time prep
    y3 = jax.block_until_ready(linear_block_apply(x3, w3_t, b3_row, out3_sz))
    y3_ref = x3 @ w3.T + bb3.reshape(1, out3)
    assert y3.shape == (b3_, out3)
    assert jnp.allclose(y3, y3_ref, atol=1e-4, rtol=1e-4)

    # TODO(synk): the analog crossbar registration / remap() (cb.register_linear,
    # ticket.vmm non-idealities) has no Pallas equivalent; the ideal VMM forward
    # math is what is implemented here.
    print("KERNEL_OK")
</pallas_src>

<mosaic_0001>
module attributes {stable_mosaic.version = 11 : i64} {
  func.func @_linear_block_kernel(%arg0: i32, %arg1: i32, %arg2: i32, %arg3: memref<8x128xf32, #tpu.memory_space<vmem>>, %arg4: memref<128x128xf32, #tpu.memory_space<vmem>>, %arg5: memref<1x128xf32, #tpu.memory_space<vmem>>, %arg6: memref<8x128xf32, #tpu.memory_space<vmem>>) attributes {dimension_semantics = [#tpu.dimension_semantics<parallel>, #tpu.dimension_semantics<parallel>, #tpu.dimension_semantics<arbitrary>], iteration_bounds = array<i64: 1, 1, 1>, scalar_prefetch = 0 : i64, scratch_operands = 0 : i64, tpu.core_type = #tpu.core_type<tc>, window_params = [{transform_indices = @transform_0, window_bounds = array<i64: 8, 128>}, {transform_indices = @transform_1, window_bounds = array<i64: 128, 128>}, {transform_indices = @transform_2, window_bounds = array<i64: 1, 128>}, {transform_indices = @transform_3, window_bounds = array<i64: 8, 128>}]} {
    %c0 = arith.constant 0 : index
    %c0_0 = arith.constant 0 : index
    %0 = vector.load %arg3[%c0, %c0_0] : memref<8x128xf32, #tpu.memory_space<vmem>>, vector<8x128xf32>
    %c0_1 = arith.constant 0 : index
    %c0_2 = arith.constant 0 : index
    %1 = vector.load %arg4[%c0_1, %c0_2] : memref<128x128xf32, #tpu.memory_space<vmem>>, vector<128x128xf32>
    %cst = arith.constant dense<0.000000e+00> : vector<8x128xf32>
    %2 = tpu.matmul %0, %1, %cst {dimension_numbers = #tpu.dot_dimension_numbers<[1], [0], [0], [1], [0, 0, 1, 1], [], []>} : vector<8x128xf32>, vector<128x128xf32>, vector<8x128xf32> -> vector<8x128xf32>
    %c0_i32 = arith.constant 0 : i32
    %3 = arith.cmpi eq, %arg2, %c0_i32 : i32
    %4 = arith.extui %3 : i1 to i32
    %c0_i32_3 = arith.constant 0 : i32
    %5 = arith.cmpi ne, %4, %c0_i32_3 : i32
    scf.if %5 {
      %c0_6 = arith.constant 0 : index
      %c0_7 = arith.constant 0 : index
      %9 = vector.load %arg5[%c0_6, %c0_7] : memref<1x128xf32, #tpu.memory_space<vmem>>, vector<1x128xf32>
      %10 = vector.broadcast %9 : vector<1x128xf32> to vector<8x128xf32>
      %11 = arith.addf %10, %2 : vector<8x128xf32>
      %c0_8 = arith.constant 0 : index
      %c0_9 = arith.constant 0 : index
      %12 = vector.load %arg6[%c0_8, %c0_9] : memref<8x128xf32, #tpu.memory_space<vmem>>, vector<8x128xf32>
      tpu.vector_store %arg6[%c0_8, %c0_9], %11 {strides = array<i32>} : memref<8x128xf32, #tpu.memory_space<vmem>>, vector<8x128xf32>,
    } else {
    }
    %c0_i32_4 = arith.constant 0 : i32
    %6 = arith.cmpi ne, %arg2, %c0_i32_4 : i32
    %7 = arith.extui %6 : i1 to i32
    %c0_i32_5 = arith.constant 0 : i32
    %8 = arith.cmpi ne, %7, %c0_i32_5 : i32
    scf.if %8 {
      %c0_6 = arith.constant 0 : index
      %c0_7 = arith.constant 0 : index
      %9 = vector.load %arg6[%c0_6, %c0_7] : memref<8x128xf32, #tpu.memory_space<vmem>>, vector<8x128xf32>
      %10 = arith.addf %9, %2 : vector<8x128xf32>
      %c0_8 = arith.constant 0 : index
      %c0_9 = arith.constant 0 : index
      %11 = vector.load %arg6[%c0_8, %c0_9] : memref<8x128xf32, #tpu.memory_space<vmem>>, vector<8x128xf32>
      tpu.vector_store %arg6[%c0_8, %c0_9], %10 {strides = array<i32>} : memref<8x128xf32, #tpu.memory_space<vmem>>, vector<8x128xf32>,
    } else {
    }
    return
  }
  func.func @transform_0(%arg0: i32, %arg1: i32, %arg2: i32) -> (i32, i32) {
    %c0_i32 = arith.constant 0 : i32
    return %arg0, %arg2 : i32, i32
  }
  func.func @transform_1(%arg0: i32, %arg1: i32, %arg2: i32) -> (i32, i32) {
    %c0_i32 = arith.constant 0 : i32
    return %arg2, %arg1 : i32, i32
  }
  func.func @transform_2(%arg0: i32, %arg1: i32, %arg2: i32) -> (i32, i32) {
    %c0_i32 = arith.constant 0 : i32
    %c0_i32_0 = arith.constant 0 : i32
    return %c0_i32, %arg1 : i32, i32
  }
  func.func @transform_3(%arg0: i32, %arg1: i32, %arg2: i32) -> (i32, i32) {
    %c0_i32 = arith.constant 0 : i32
    return %arg0, %arg1 : i32, i32
  }
}

</mosaic_0001>

<bundles_post_ra>
// kernel: tpu_custom_call.1
= control target key start
LH: loop header
LB: loop body
LE: loop exit
PB: predicated region body
PF: predicated region fallthrough
CT: control target
= control target key end

     0   :  { %8 = vsyncpa [#allocation3], 0  ;;  %s395_s0 = inlined_call_operand.hbm [shape: f32[8,128], index: 0, kind: input, shape index: {}]   ;;  %s396_s1 = inlined_call_operand.hbm [shape: f32[128,128], index: 1, kind: input, shape index: {}]   ;;  %s397_s2 = inlined_call_operand.vmem [shape: f32[1,128], index: 2, kind: input, shape index: {}]   ;;  %s398_s3 = inlined_call_operand.hbm [shape: f32[8,128], index: 3, kind: output, shape index: {}]  }
   0x1   :  { %9 = vsyncpa [#allocation6], 0 }
   0x2   :  { %10 = vsyncpa [#allocation4], 0  ;;  %s321_s12 = smov [#allocation2]   ;;  %s322_s14 = smov [#allocation5]  }
   0x3   :  { %s17_s13 = sshll.u32 %s321_s12, 4  ;;  %s26_s15 = sshll.u32 %s322_s14, 4  ;;  %s18_s13 = int_to_ptr.vmem [resolvable:$true] %s17_s13  ;;  %s349_s15 = int_to_ptr.vmem [resolvable:$true] %s26_s15 }
   0x4   :  { %s249_s18 = scalar_lea.hbm %s395_s0, 128 }
   0x5   :  { %p250_p0 = scmp.ne.s32.totalorder %s395_s0, %s249_s18  ;;  %p253_p1 = scmp.lt.u32.totalorder %s249_s18, %s395_s0 }
   0x7   :  { %p255_p2 = pnand %p253_p1, %p250_p0 }
   0x9   :  { %258 = shalt.err (!%p255_p2)
}
   0xa   :  { %s259_s23 = scalar_lea.vmem %s18_s13, 128  ;;  %p264_p4 = scmp.lt.s32.totalorder %s18_s13, %s18_s13 }
   0xb   :  { %p260_p3 = scmp.ne.s32.totalorder %s18_s13, %s259_s23  ;;  %p265_p5 = scmp.lt.s32.totalorder %s259_s23, %s259_s23 }
   0xd   :  { %p266_p6 = por %p265_p5, %p264_p4 }
   0xf   :  { %p267_p7 = pnand %p266_p6, %p260_p3 }
  0x11   :  { %270 = shalt.err (!%p267_p7)
}
  0x12   :  { %20 = dma.hbm_to_vmem [thread:$0]  %s395_s0, 128, %s18_s13, [#allocation3]  }
  0x13   :  { %s271_s28 = scalar_lea.hbm %s396_s1, 2048 }
  0x14   :  { %p272_p8 = scmp.ne.s32.totalorder %s396_s1, %s271_s28  ;;  %p275_p9 = scmp.lt.u32.totalorder %s271_s28, %s396_s1 }
  0x16   :  { %p277_p10 = pnand %p275_p9, %p272_p8 }
  0x18   :  { %280 = shalt.err (!%p277_p10)
}
  0x19   :  { %s281_s6 = scalar_lea.vmem %s349_s15, 2048  ;;  %p286_p12 = scmp.lt.s32.totalorder %s349_s15, %s349_s15 }
  0x1a   :  { %p282_p11 = scmp.ne.s32.totalorder %s349_s15, %s281_s6  ;;  %p287_p13 = scmp.lt.s32.totalorder %s281_s6, %s281_s6 }
  0x1c   :  { %p288_p0 = por %p287_p13, %p286_p12 }
  0x1e   :  { %p289_p1 = pnand %p288_p0, %p282_p11 }
  0x20   :  { %292 = shalt.err (!%p289_p1)
}
  0x21   :  { %s323_s0 = smov 128   ;;  %s324_s7 = smov 8  }
  0x22   :  { %32 = dma.hbm_to_vmem [thread:$0]  %s396_s1, 2048, %s349_s15, [#allocation6], %s323_s0, %s323_s0, %s324_s7  }
  0x23   :  { %315 = dma.done.wait [#allocation3], 128  }
  0x24   :  { %316 = vsyncadd [#allocation3], 4294967168 }
  0x25   :  { %317 = dma.done.wait [#allocation6], 2048  }
  0x26   :  { %318 = vsyncadd [#allocation6], 4294965248  ;;  %v325_v0 = vmov 0.0|0.0   ;;  %vm326_vm0 = vmmov 0   ;;  %v327_v1 = vmov 0.0   ;;  %v42_v2 = vld [vmem:[#allocation5] sm:$0xff] }
  0x27   :  { %217 = vmatprep.subr.bf16.mxu0 %v325_v0  ;;  %214 = vmatprep.mubr.msk.f32.mxu0 %vm326_vm0, %v327_v1  ;;  %v43_v3 = vld [vmem:[#allocation5 + $0x8] sm:$0xff]  ;;  %v44_v4 = vld [vmem:[#allocation5 + $0x10] sm:$0xff]  ;;  %v45_v6 = vld [vmem:[#allocation5 + $0x18] sm:$0xff]  ;;  %s328_s11 = smov [#allocation7]  }
  0x28   :  { %v218_v5 = vpack.c.bf16 %v43_v3, %v42_v2  ;;  %v221_v7 = vpack.c.bf16 %v45_v6, %v44_v4  ;;  %v46_v8 = vld [vmem:[#allocation5 + $0x20] sm:$0xff]  ;;  %v47_v9 = vld [vmem:[#allocation5 + $0x28] sm:$0xff]  ;;  %v48_v11 = vld [vmem:[#allocation5 + $0x30] sm:$0xff]  ;;  %s154_s12 = sshll.u32 %s328_s11, 4  ;;  %s155_s12 = int_to_ptr.vmem [resolvable:$true] %s154_s12 }
  0x29   :  { %v224_v10 = vpack.c.bf16 %v47_v9, %v46_v8  ;;  %v49_v12 = vld [vmem:[#allocation5 + $0x38] sm:$0xff]  ;;  %v50_v14 = vld [vmem:[#allocation5 + $0x40] sm:$0xff]  ;;  %v51_v15 = vld [vmem:[#allocation5 + $0x48] sm:$0xff]  ;;  %s293_s13 = scalar_lea.vmem %s155_s12, 128  ;;  %p298_p3 = scmp.lt.s32.totalorder %s155_s12, %s155_s12 }
  0x2a   :  { %219 = vmatpush3.bf16.msra.mxu0 %v218_v5  ;;  %v227_v13 = vpack.c.bf16 %v49_v12, %v48_v11  ;;  %v230_v16 = vpack.c.bf16 %v51_v15, %v50_v14  ;;  %v52_v17 = vld [vmem:[#allocation5 + $0x50] sm:$0xff]  ;;  %v53_v18 = vld [vmem:[#allocation5 + $0x58] sm:$0xff]  ;;  %v54_v20 = vld [vmem:[#allocation5 + $0x60] sm:$0xff]  ;;  %p294_p2 = scmp.ne.s32.totalorder %s155_s12, %s293_s13  ;;  %p299_p4 = scmp.lt.s32.totalorder %s293_s13, %s293_s13 }
  0x2b   :  { %220 = vmatprep.subr.bf16.mxu0 %v325_v0  ;;  %v233_v19 = vpack.c.bf16 %v53_v18, %v52_v17  ;;  %v55_v21 = vld [vmem:[#allocation5 + $0x68] sm:$0xff]  ;;  %v56_v23 = vld [vmem:[#allocation5 + $0x70] sm:$0xff]  ;;  %v57_v24 = vld [vmem:[#allocation5 + $0x78] sm:$0xff] }
  0x2c   :  { %v236_v22 = vpack.c.bf16 %v55_v21, %v54_v20  ;;  %v239_v25 = vpack.c.bf16 %v57_v24, %v56_v23  ;;  %v41_v26 = vld [vmem:[#allocation2] sm:$0xff]  ;;  %p300_p5 = por %p299_p4, %p298_p3 }
  0x2d   :  { %v164_v27 = vld [vmem:[%s397_s2] ss:$0 sm:$0xff] }
  0x2e   :  { %222 = vmatpush3.bf16.msra.mxu0 %v221_v7  ;;  %p301_p6 = pnand %p300_p5, %p294_p2 }
  0x2f   :  { %223 = vmatprep.subr.bf16.mxu0 %v325_v0 }
  0x32   :  { %225 = vmatpush3.bf16.msra.mxu0 %v224_v10 }
  0x33   :  { %226 = vmatprep.subr.bf16.mxu0 %v325_v0 }
  0x36   :  { %228 = vmatpush3.bf16.msra.mxu0 %v227_v13 }
  0x37   :  { %229 = vmatprep.subr.bf16.mxu0 %v325_v0 }
  0x3a   :  { %231 = vmatpush3.bf16.msra.mxu0 %v230_v16 }
  0x3b   :  { %232 = vmatprep.subr.bf16.mxu0 %v325_v0 }
  0x3e   :  { %234 = vmatpush3.bf16.msra.mxu0 %v233_v19 }
  0x3f   :  { %235 = vmatprep.subr.bf16.mxu0 %v325_v0 }
  0x42   :  { %237 = vmatpush3.bf16.msra.mxu0 %v236_v22 }
  0x43   :  { %238 = vmatprep.subr.bf16.mxu0 %v325_v0 }
  0x46   :  { %240 = vmatpush3.bf16.msra.mxu0 %v239_v25 }
  0x49   :  { %215 = vmatmul.mubr.f32.vlgmr.msra.gmra.mrb[0].mxu0 %v41_v26 }
 0x11c   :  { %v124_v28 = vpop.f32.mrb[0].mxu0 }
 0x11d   :  { %v139_v29 = vadd.f32 %v164_v27, %v124_v28  ;;  %v216_v30 = vpop.f32.mrb[1].mxu0 }
 0x11f   :  { %140 = vst [vmem:[#allocation7] sm:$0xff] %v139_v29 }
 0x120   :  { %304 = shalt.err (!%p301_p6)
}
 0x121   :  { %s305_s16 = scalar_lea.hbm %s398_s3, 128 }
 0x122   :  { %p306_p7 = scmp.ne.s32.totalorder %s398_s3, %s305_s16  ;;  %p309_p8 = scmp.lt.u32.totalorder %s305_s16, %s398_s3 }
 0x124   :  { %p311_p9 = pnand %p309_p8, %p306_p7 }
 0x126   :  { %314 = shalt.err (!%p311_p9)
}
 0x127   :  { %157 = dma.vmem_to_hbm [thread:$0]  %s155_s12, 128, %s398_s3, [#allocation4]  }
 0x128   :  { %319 = dma.done.wait [#allocation4], 128  }
 0x129   :  { %320 = vsyncadd [#allocation4], 4294967168 }
 0x12a   :  { %161 = vsyncpa [#allocation3], 1 }
 0x12b   :  { %162 = vsyncpa [#allocation6], 1 }
 0x12c   :  { %163 = vsyncpa [#allocation4], 1 }

</bundles_post_ra>
